<compile_context>
chip_gen: v7x
topology: tpu7x:2x2x1
jax: 0.10.0
libtpu: 0.0.40
codegen_flags: <defaults>
</compile_context>

<pallas_src>
import jax
import jax.numpy as jnp
from jax.experimental import pallas as pl
from jax.experimental.pallas import tpu as pltpu


def _round_up(x, m):
    return ((x + m - 1) // m) * m


def regressor_kernel(x_ref, w_ref, b_ref, o_ref):
    """One batch block.

    x_ref: [Dp, Bblk]   (features on sublanes, batch on lanes)
    w_ref: [L, Dp, Dp]  packed, zero-padded weights in [out, in] layout
    b_ref: [L, Dp, 1]   packed, zero-padded biases
    o_ref: [Dp, Bblk]
    """
    n_layers = w_ref.shape[0]
    h = x_ref[...]
    for l in range(n_layers - 1):
        h = jnp.dot(w_ref[l], h, preferred_element_type=jnp.float32) + b_ref[l]
        h = jnp.maximum(h, 0.0)                       # ReLU
    h = jnp.dot(w_ref[n_layers - 1], h,
                preferred_element_type=jnp.float32) + b_ref[n_layers - 1]
    o_ref[...] = jnp.tanh(h)                          # Tanh


def pack_params(params, dp):
    """Zero-pad every layer to a uniform [dp, dp] / [dp, 1] and stack."""
    n = len(params)
    w_slab = jnp.zeros((n, dp, dp), jnp.float32)
    b_slab = jnp.zeros((n, dp, 1), jnp.float32)
    for l, (w, b) in enumerate(params):
        out_d, in_d = w.shape
        w_slab = w_slab.at[l, :out_d, :in_d].set(w.astype(jnp.float32))
        b_slab = b_slab.at[l, :out_d, 0].set(b.astype(jnp.float32))
    return w_slab, b_slab


def regressor_forward(x, params, b_blk=None):
    """params = [(W0,b0), ..., (W3,b3)] with W in PyTorch [out, in] layout."""
    batch, input_dim = x.shape
    output_dim = params[-1][0].shape[0]
    n_layers = len(params)

    feat_dims = [input_dim] + [w.shape[0] for w, _ in params]
    dp = _round_up(max(feat_dims), 8)            # padded feature dim (sublanes)

    if b_blk is None:
        b_blk = min(512, _round_up(batch, 128))  # lane-dense batch tile
    batch_p = _round_up(batch, b_blk)

    # Transpose + zero-pad the input once on the wrapper side: [dp, batch_p].
    x_t = jnp.zeros((dp, batch_p), jnp.float32)
    x_t = x_t.at[:input_dim, :batch].set(x.astype(jnp.float32).T)

    w_slab, b_slab = pack_params(params, dp)

    grid = (batch_p // b_blk,)
    out_t = pl.pallas_call(
        regressor_kernel,
        out_shape=jax.ShapeDtypeStruct((dp, batch_p), jnp.float32),
        grid_spec=pltpu.PrefetchScalarGridSpec(
            num_scalar_prefetch=0,
            grid=grid,
            in_specs=[
                # activations: one batch block per grid step
                pl.BlockSpec((dp, b_blk), lambda i: (0, i)),
                # packed weights / biases: constant index -> VMEM-resident
                pl.BlockSpec((n_layers, dp, dp), lambda i: (0, 0, 0)),
                pl.BlockSpec((n_layers, dp, 1), lambda i: (0, 0, 0)),
            ],
            out_specs=pl.BlockSpec((dp, b_blk), lambda i: (0, i)),
        ),
        compiler_params=pltpu.CompilerParams(
            dimension_semantics=("parallel",)),
    )(x_t, w_slab, b_slab)

    # Strip feature/batch padding and return to [batch, output_dim].
    return out_t[:output_dim, :batch].T


def init_linear(key, in_dim, out_dim):
    """torch.nn.Linear-style init; W kept in PyTorch [out, in] layout."""
    kw, kb = jax.random.split(key)
    bound = 1.0 / jnp.sqrt(jnp.float32(in_dim))
    w = jax.random.uniform(kw, (out_dim, in_dim), jnp.float32, -bound, bound)
    b = jax.random.uniform(kb, (out_dim,), jnp.float32, -bound, bound)
    return w, b


def reference_forward(x, params):
    h = x
    for i, (w, b) in enumerate(params):
        h = h @ w.T + b
        h = jnp.tanh(h) if i == len(params) - 1 else jnp.maximum(h, 0.0)
    return h


if __name__ == "__main__":
    input_dim, h_dim, output_dim = 2, 20, 4
    batch = 8

    key = jax.random.PRNGKey(0)
    k_x, k0, k1, k2, k3 = jax.random.split(key, 5)

    x = jax.random.normal(k_x, (batch, input_dim), jnp.float32)

    params = [
        init_linear(k0, input_dim, h_dim),   # input_layer
        init_linear(k1, h_dim, h_dim),       # layer1
        init_linear(k2, h_dim, h_dim),       # layer2
        init_linear(k3, h_dim, output_dim),  # output_layer
    ]

    out = jax.block_until_ready(regressor_forward(x, params))
    ref = reference_forward(x, params)
    assert out.shape == (batch, output_dim)
    assert jnp.allclose(out, ref, atol=1e-5, rtol=1e-5)

    # Also exercise the multi-step batch grid + batch-padding path.
    x_big = jax.random.normal(jax.random.PRNGKey(1), (300, input_dim), jnp.float32)
    out_big = jax.block_until_ready(regressor_forward(x_big, params, b_blk=128))
    ref_big = reference_forward(x_big, params)
    assert out_big.shape == (300, output_dim)
    assert jnp.allclose(out_big, ref_big, atol=1e-5, rtol=1e-5)

    print("KERNEL_OK")
</pallas_src>

<mosaic_0001>
module attributes {stable_mosaic.version = 11 : i64} {
  func.func @regressor_kernel(%arg0: i32, %arg1: memref<24x128xf32, #tpu.memory_space<vmem>>, %arg2: memref<4x24x24xf32, #tpu.memory_space<vmem>>, %arg3: memref<4x24x1xf32, #tpu.memory_space<vmem>>, %arg4: memref<24x128xf32, #tpu.memory_space<vmem>>) attributes {dimension_semantics = [#tpu.dimension_semantics<parallel>], iteration_bounds = array<i64: 1>, scalar_prefetch = 0 : i64, scratch_operands = 0 : i64, tpu.core_type = #tpu.core_type<tc>, window_params = [{transform_indices = @transform_0, window_bounds = array<i64: 24, 128>}, {pipeline_mode = #tpu.pipeline_mode<synchronous>, transform_indices = @transform_1, window_bounds = array<i64: 4, 24, 24>}, {pipeline_mode = #tpu.pipeline_mode<synchronous>, transform_indices = @transform_2, window_bounds = array<i64: 4, 24, 1>}, {transform_indices = @transform_3, window_bounds = array<i64: 24, 128>}]} {
    %c0 = arith.constant 0 : index
    %c0_0 = arith.constant 0 : index
    %0 = vector.load %arg1[%c0, %c0_0] : memref<24x128xf32, #tpu.memory_space<vmem>>, vector<24x128xf32>
    %c0_1 = arith.constant 0 : index
    %c0_2 = arith.constant 0 : index
    %c0_3 = arith.constant 0 : index
    %1 = vector.load %arg2[%c0_1, %c0_2, %c0_3] : memref<4x24x24xf32, #tpu.memory_space<vmem>>, vector<1x24x24xf32>
    %2 = vector.shape_cast %1 : vector<1x24x24xf32> to vector<24x24xf32>
    %cst = arith.constant dense<0.000000e+00> : vector<24x128xf32>
    %3 = tpu.matmul %2, %0, %cst {dimension_numbers = #tpu.dot_dimension_numbers<[1], [0], [0], [1], [0, 0, 1, 1], [], []>} : vector<24x24xf32>, vector<24x128xf32>, vector<24x128xf32> -> vector<24x128xf32>
    %c0_4 = arith.constant 0 : index
    %c0_5 = arith.constant 0 : index
    %c0_6 = arith.constant 0 : index
    %4 = vector.load %arg3[%c0_4, %c0_5, %c0_6] : memref<4x24x1xf32, #tpu.memory_space<vmem>>, vector<1x24x1xf32>
    %5 = vector.shape_cast %4 : vector<1x24x1xf32> to vector<24x1xf32>
    %6 = vector.broadcast %5 : vector<24x1xf32> to vector<24x128xf32>
    %7 = arith.addf %3, %6 : vector<24x128xf32>
    %cst_7 = arith.constant 0.000000e+00 : f32
    %8 = vector.broadcast %cst_7 : f32 to vector<24x128xf32>
    %9 = arith.maximumf %7, %8 : vector<24x128xf32>
    %c1 = arith.constant 1 : index
    %c0_8 = arith.constant 0 : index
    %c0_9 = arith.constant 0 : index
    %10 = vector.load %arg2[%c1, %c0_8, %c0_9] : memref<4x24x24xf32, #tpu.memory_space<vmem>>, vector<1x24x24xf32>
    %11 = vector.shape_cast %10 : vector<1x24x24xf32> to vector<24x24xf32>
    %cst_10 = arith.constant dense<0.000000e+00> : vector<24x128xf32>
    %12 = tpu.matmul %11, %9, %cst_10 {dimension_numbers = #tpu.dot_dimension_numbers<[1], [0], [0], [1], [0, 0, 1, 1], [], []>} : vector<24x24xf32>, vector<24x128xf32>, vector<24x128xf32> -> vector<24x128xf32>
    %c1_11 = arith.constant 1 : index
    %c0_12 = arith.constant 0 : index
    %c0_13 = arith.constant 0 : index
    %13 = vector.load %arg3[%c1_11, %c0_12, %c0_13] : memref<4x24x1xf32, #tpu.memory_space<vmem>>, vector<1x24x1xf32>
    %14 = vector.shape_cast %13 : vector<1x24x1xf32> to vector<24x1xf32>
    %15 = vector.broadcast %14 : vector<24x1xf32> to vector<24x128xf32>
    %16 = arith.addf %12, %15 : vector<24x128xf32>
    %cst_14 = arith.constant 0.000000e+00 : f32
    %17 = vector.broadcast %cst_14 : f32 to vector<24x128xf32>
    %18 = arith.maximumf %16, %17 : vector<24x128xf32>
    %c2 = arith.constant 2 : index
    %c0_15 = arith.constant 0 : index
    %c0_16 = arith.constant 0 : index
    %19 = vector.load %arg2[%c2, %c0_15, %c0_16] : memref<4x24x24xf32, #tpu.memory_space<vmem>>, vector<1x24x24xf32>
    %20 = vector.shape_cast %19 : vector<1x24x24xf32> to vector<24x24xf32>
    %cst_17 = arith.constant dense<0.000000e+00> : vector<24x128xf32>
    %21 = tpu.matmul %20, %18, %cst_17 {dimension_numbers = #tpu.dot_dimension_numbers<[1], [0], [0], [1], [0, 0, 1, 1], [], []>} : vector<24x24xf32>, vector<24x128xf32>, vector<24x128xf32> -> vector<24x128xf32>
    %c2_18 = arith.constant 2 : index
    %c0_19 = arith.constant 0 : index
    %c0_20 = arith.constant 0 : index
    %22 = vector.load %arg3[%c2_18, %c0_19, %c0_20] : memref<4x24x1xf32, #tpu.memory_space<vmem>>, vector<1x24x1xf32>
    %23 = vector.shape_cast %22 : vector<1x24x1xf32> to vector<24x1xf32>
    %24 = vector.broadcast %23 : vector<24x1xf32> to vector<24x128xf32>
    %25 = arith.addf %21, %24 : vector<24x128xf32>
    %cst_21 = arith.constant 0.000000e+00 : f32
    %26 = vector.broadcast %cst_21 : f32 to vector<24x128xf32>
    %27 = arith.maximumf %25, %26 : vector<24x128xf32>
    %c3 = arith.constant 3 : index
    %c0_22 = arith.constant 0 : index
    %c0_23 = arith.constant 0 : index
    %28 = vector.load %arg2[%c3, %c0_22, %c0_23] : memref<4x24x24xf32, #tpu.memory_space<vmem>>, vector<1x24x24xf32>
    %29 = vector.shape_cast %28 : vector<1x24x24xf32> to vector<24x24xf32>
    %cst_24 = arith.constant dense<0.000000e+00> : vector<24x128xf32>
    %30 = tpu.matmul %29, %27, %cst_24 {dimension_numbers = #tpu.dot_dimension_numbers<[1], [0], [0], [1], [0, 0, 1, 1], [], []>} : vector<24x24xf32>, vector<24x128xf32>, vector<24x128xf32> -> vector<24x128xf32>
    %c3_25 = arith.constant 3 : index
    %c0_26 = arith.constant 0 : index
    %c0_27 = arith.constant 0 : index
    %31 = vector.load %arg3[%c3_25, %c0_26, %c0_27] : memref<4x24x1xf32, #tpu.memory_space<vmem>>, vector<1x24x1xf32>
    %32 = vector.shape_cast %31 : vector<1x24x1xf32> to vector<24x1xf32>
    %33 = vector.broadcast %32 : vector<24x1xf32> to vector<24x128xf32>
    %34 = arith.addf %30, %33 : vector<24x128xf32>
    %35 = math.tanh %34 : vector<24x128xf32>
    %c0_28 = arith.constant 0 : index
    %c0_29 = arith.constant 0 : index
    %36 = vector.load %arg4[%c0_28, %c0_29] : memref<24x128xf32, #tpu.memory_space<vmem>>, vector<24x128xf32>
    tpu.vector_store %arg4[%c0_28, %c0_29], %35 {strides = array<i32>} : memref<24x128xf32, #tpu.memory_space<vmem>>, vector<24x128xf32>,
    return
  }
  func.func @transform_0(%arg0: i32) -> (i32, i32) {
    %c0_i32 = arith.constant 0 : i32
    %c0_i32_0 = arith.constant 0 : i32
    return %c0_i32, %arg0 : i32, i32
  }
  func.func @transform_1(%arg0: i32) -> (i32, i32, i32) {
    %c0_i32 = arith.constant 0 : i32
    %c0_i32_0 = arith.constant 0 : i32
    %c0_i32_1 = arith.constant 0 : i32
    %c0_i32_2 = arith.constant 0 : i32
    return %c0_i32, %c0_i32_0, %c0_i32_1 : i32, i32, i32
  }
  func.func @transform_2(%arg0: i32) -> (i32, i32, i32) {
    %c0_i32 = arith.constant 0 : i32
    %c0_i32_0 = arith.constant 0 : i32
    %c0_i32_1 = arith.constant 0 : i32
    %c0_i32_2 = arith.constant 0 : i32
    return %c0_i32, %c0_i32_0, %c0_i32_1 : i32, i32, i32
  }
  func.func @transform_3(%arg0: i32) -> (i32, i32) {
    %c0_i32 = arith.constant 0 : i32
    %c0_i32_0 = arith.constant 0 : i32
    return %c0_i32, %arg0 : i32, i32
  }
}

</mosaic_0001>

<bundles_post_ra>
// kernel: tpu_custom_call.1
= control target key start
LH: loop header
LB: loop body
LE: loop exit
PB: predicated region body
PF: predicated region fallthrough
CT: control target
= control target key end

     0   :  { %8 = vsyncpa [#allocation3], 0  ;;  %s875_s0 = inlined_call_operand.hbm [shape: f32[24,128], index: 0, kind: input, shape index: {}]   ;;  %s876_s1 = inlined_call_operand.vmem [shape: f32[4,24,24], index: 1, kind: input, shape index: {}]   ;;  %s877_s2 = inlined_call_operand.vmem [shape: f32[4,24,1], index: 2, kind: input, shape index: {}]   ;;  %s878_s3 = inlined_call_operand.hbm [shape: f32[24,128], index: 3, kind: output, shape index: {}]  }
   0x1   :  { %9 = vsyncpa [#allocation4], 0  ;;  %s701_s12 = smov [#allocation2]   ;;  %s653_s16 = scalar_lea.hbm %s875_s0, 384 }
   0x2   :  { %s15_s13 = sshll.u32 %s701_s12, 4  ;;  %p654_p0 = scmp.ne.s32.totalorder %s875_s0, %s653_s16  ;;  %s16_s13 = int_to_ptr.vmem [resolvable:$true] %s15_s13 }
   0x3   :  { %p657_p1 = scmp.lt.u32.totalorder %s653_s16, %s875_s0 }
   0x5   :  { %p659_p2 = pnand %p657_p1, %p654_p0 }
   0x7   :  { %662 = shalt.err (!%p659_p2)
}
   0x8   :  { %s663_s21 = scalar_lea.vmem %s16_s13, 384  ;;  %p668_p4 = scmp.lt.s32.totalorder %s16_s13, %s16_s13 }
   0x9   :  { %p664_p3 = scmp.ne.s32.totalorder %s16_s13, %s663_s21  ;;  %p669_p5 = scmp.lt.s32.totalorder %s663_s21, %s663_s21 }
   0xb   :  { %p670_p6 = por %p669_p5, %p668_p4 }
   0xd   :  { %p671_p7 = pnand %p670_p6, %p664_p3 }
   0xf   :  { %674 = shalt.err (!%p671_p7)
}
  0x10   :  { %s702_s22 = smov 128   ;;  %s703_s23 = smov 8  }
  0x11   :  { %21 = dma.hbm_to_vmem [thread:$0]  %s875_s0, 384, %s16_s13, [#allocation3], %s702_s22, %s702_s22, %s703_s23  }
  0x12   :  { %697 = dma.done.wait [#allocation3], 384  }
  0x13   :  { %698 = vsyncadd [#allocation3], 4294966912  ;;  %v704_v0 = vmov 0.0|0.0   ;;  %vm705_vm0 = vmmov 0   ;;  %v706_v1 = vmov 0.0   ;;  %v707_v2 = vmov 0  }
  0x14   :  { %625 = vmatprep.subr.bf16.mxu0 %v704_v0  ;;  %571 = vmatprep.mubr.msk.f32.mxu0 %vm705_vm0, %v706_v1  ;;  %v29_v3 = vld [vmem:[#allocation2] sm:$0xff]  ;;  %v30_v4 = vld [vmem:[#allocation2 + $0x8] sm:$0xff]  ;;  %v37_v7 = vld [vmem:[%s877_s2 + $0x10] sm:$0xff]  ;;  %vm53_vm1 = vcmask 195584  }
  0x15   :  { %645 = vset.pattern.permute.xlu0 %v707_v2  ;;  %646 = vset.pattern.permute.xlu1 %v707_v2  ;;  %v626_v5 = vpack.c.bf16 %v30_v4, %v29_v3  ;;  %v35_v6 = vld [vmem:[%s877_s2] sm:$0xff]  ;;  %v31_v8 = vld [vmem:[#allocation2 + $0x10] sm:$0xff]  ;;  %v36_v9 = vld [vmem:[%s877_s2 + $0x8] sm:$0xff] }
  0x16   :  { %628 = vmatprep.subr.bf16.mxu1 %v704_v0  ;;  %586 = vmatprep.mubr.msk.f32.mxu1 %vm705_vm0, %v706_v1  ;;  %v32_v10 = vld [vmem:[%s876_s1] sm:$0xff]  ;;  %v517_v11 = vld [vmem:[%s877_s2 + $0x18] sm:$0xff]  ;;  %v33_v13 = vld [vmem:[%s876_s1 + $0x8] sm:$0xff] }
  0x17   :  { %627 = vmatpush3.bf16.msra.mxu0 %v626_v5  ;;  %40 = vperm.xlu0 %645, %v35_v6   ;;  %v518_v12 = vld [vmem:[%s877_s2 + $0x20] sm:$0xff]  ;;  %v519_v14 = vld [vmem:[%s877_s2 + $0x28] sm:$0xff]  ;;  %v526_v15 = vld [vmem:[%s877_s2 + $0x30] sm:$0xff] }
  0x18   :  { %569 = vmatprep.subr.mxu0 %v706_v1  ;;  %50 = vperm.xlu1 %646, %v37_v7   ;;  %v34_v16 = vld [vmem:[%s876_s1 + $0x10] sm:$0xff]  ;;  %v527_v17 = vld [vmem:[%s877_s2 + $0x38] sm:$0xff]  ;;  %v528_v18 = vld [vmem:[%s877_s2 + $0x40] sm:$0xff] }
  0x19   :  { %v535_v19 = vld [vmem:[%s877_s2 + $0x48] sm:$0xff]  ;;  %v536_v20 = vld [vmem:[%s877_s2 + $0x50] sm:$0xff]  ;;  %v537_v21 = vld [vmem:[%s877_s2 + $0x58] sm:$0xff] }
  0x1a   :  { %v514_v38 = vld [vmem:[%s876_s1 + $0x18] sm:$0xff]  ;;  %v515_v39 = vld [vmem:[%s876_s1 + $0x20] sm:$0xff]  ;;  %v516_v40 = vld [vmem:[%s876_s1 + $0x28] sm:$0xff] }
  0x1b   :  { %570 = vmatpush3.msra.mxu0 %v31_v8  ;;  %45 = vperm.xlu0 %645, %v36_v9   ;;  %v523_v57 = vld [vmem:[%s876_s1 + $0x30] sm:$0xff]  ;;  %v524_v58 = vld [vmem:[%s876_s1 + $0x38] sm:$0xff]  ;;  %v525_v59 = vld [vmem:[%s876_s1 + $0x40] sm:$0xff] }
  0x1c   :  { %572 = vmatmul.mubr.msk.f32.vlgmr.msra.gmra.mrb[0].mxu0 %vm53_vm1, %v32_v10  ;;  %156 = vperm.xlu1 %646, %v517_v11  }
  0x1d   :  { %574 = vmatprep.mubr.msk.f32.mxu0 %vm705_vm0, %v706_v1  ;;  %631 = vmatprep.subr.bf16.mxu0 %v704_v0 }
  0x1f   :  { %161 = vperm.xlu0 %645, %v518_v12  }
  0x20   :  { %575 = vmatmul.mubr.msk.f32.gmra.mrb[2].mxu0 %vm53_vm1, %v33_v13  ;;  %166 = vperm.xlu1 %646, %v519_v14   ;;  %v532_v13 = vld [vmem:[%s876_s1 + $0x48] sm:$0xff]  ;;  %v533_v14 = vld [vmem:[%s876_s1 + $0x50] sm:$0xff] }
  0x21   :  { %577 = vmatprep.mubr.msk.f32.mxu0 %vm705_vm0, %v706_v1 }
  0x23   :  { %271 = vperm.xlu0 %645, %v526_v15   ;;  %v534_v15 = vld [vmem:[%s876_s1 + $0x58] sm:$0xff]  ;;  %s708_s1 = smov [#allocation5]  }
  0x24   :  { %578 = vmatmul.mubr.msk.f32.gmra.mrb[4].mxu0 %vm53_vm1, %v34_v16  ;;  %276 = vperm.xlu1 %646, %v527_v17   ;;  %s499_s19 = sshll.u32 %s708_s1, 4  ;;  %s500_s19 = int_to_ptr.vmem [resolvable:$true] %s499_s19 }
  0x25   :  { %601 = vmatprep.mubr.msk.f32.mxu0 %vm705_vm0, %v706_v1  ;;  %s675_s20 = scalar_lea.vmem %s500_s19, 384  ;;  %p680_p9 = scmp.lt.s32.totalorder %s500_s19, %s500_s19 }
  0x26   :  { %p676_p8 = scmp.ne.s32.totalorder %s500_s19, %s675_s20  ;;  %p681_p10 = scmp.lt.s32.totalorder %s675_s20, %s675_s20 }
  0x27   :  { %281 = vperm.xlu0 %645, %v528_v18  }
  0x28   :  { %386 = vperm.xlu1 %646, %v535_v19   ;;  %p682_p11 = por %p681_p10, %p680_p9 }
  0x2a   :  { %p683_p12 = pnand %p682_p11, %p676_p8 }
  0x2b   :  { %391 = vperm.xlu0 %645, %v536_v20  }
  0x2c   :  { %396 = vperm.xlu1 %646, %v537_v21  }
  0x96   :  { %v41_v22 = vpop.permute.xlu0 %40 }
  0x97   :  { %v51_v32 = vpop.permute.xlu1 %50 }
  0x9a   :  { %v46_v26 = vpop.permute.xlu0 %45 }
  0x9b   :  { %v157_v43 = vpop.permute.xlu1 %156 }
  0x9e   :  { %v162_v45 = vpop.permute.xlu0 %161 }
  0x9f   :  { %v167_v51 = vpop.permute.xlu1 %166 }
  0xa2   :  { %v272_v62 = vpop.permute.xlu0 %271 }
  0xa6   :  { %v282_v7 = vpop.permute.xlu0 %281 }
  0xaa   :  { %v392_v20 = vpop.permute.xlu0 %391 }
  0xef   :  { %v129_v23 = vpop.f32.mrb[0].mxu0 }
  0xf0   :  { %v573_v24 = vpop.f32.mrb[1].mxu0  ;;  %v130_v25 = vadd.f32 %v129_v23, %v41_v22 }
  0xf2   :  { %v143_v30 = vmax.f32 %v130_v25, 0.0 }
  0xf3   :  { %v134_v27 = vpop.f32.mrb[2].mxu0 }
  0xf4   :  { %v135_v28 = vadd.f32 %v134_v27, %v46_v26  ;;  %v576_v29 = vpop.f32.mrb[3].mxu0 }
  0xf6   :  { %v144_v31 = vmax.f32 %v135_v28, 0.0 }
  0xf7   :  { %v139_v33 = vpop.f32.mrb[4].mxu0 }
  0xf8   :  { %v140_v34 = vadd.f32 %v139_v33, %v51_v32  ;;  %v579_v35 = vpop.f32.mrb[5].mxu0  ;;  %v629_v36 = vpack.c.bf16 %v144_v31, %v143_v30 }
  0xfa   :  { %v145_v37 = vmax.f32 %v140_v34, 0.0  ;;  %630 = vmatpush3.bf16.msra.mxu1 %v629_v36 }
  0xfb   :  { %584 = vmatprep.subr.mxu1 %v706_v1 }
  0xfe   :  { %585 = vmatpush3.msra.mxu1 %v145_v37 }
  0xff   :  { %587 = vmatmul.mubr.msk.f32.vlgmr.msra.gmra.mrb[0].mxu1 %vm53_vm1, %v514_v38  ;;  %634 = vmatprep.subr.bf16.mxu1 %v704_v0  ;;  %v277_v0 = vpop.permute.xlu1 %276 }
 0x100   :  { %589 = vmatprep.mubr.msk.f32.mxu1 %vm705_vm0, %v706_v1 }
 0x103   :  { %590 = vmatmul.mubr.msk.f32.gmra.mrb[2].mxu1 %vm53_vm1, %v515_v39  ;;  %v387_v16 = vpop.permute.xlu1 %386 }
 0x104   :  { %592 = vmatprep.mubr.msk.f32.mxu1 %vm705_vm0, %v706_v1 }
 0x107   :  { %593 = vmatmul.mubr.msk.f32.gmra.mrb[4].mxu1 %vm53_vm1, %v516_v40  ;;  %v397_v24 = vpop.permute.xlu1 %396 }
 0x108   :  { %616 = vmatprep.mubr.msk.f32.mxu1 %vm705_vm0, %v706_v1 }
 0x1d2   :  { %v244_v41 = vpop.f32.mrb[0].mxu1 }
 0x1d3   :  { %v588_v42 = vpop.f32.mrb[1].mxu1  ;;  %v245_v44 = vadd.f32 %v244_v41, %v157_v43 }
 0x1d5   :  { %v258_v49 = vmax.f32 %v245_v44, 0.0 }
 0x1d6   :  { %v249_v46 = vpop.f32.mrb[2].mxu1 }
 0x1d7   :  { %v250_v47 = vadd.f32 %v249_v46, %v162_v45  ;;  %v591_v48 = vpop.f32.mrb[3].mxu1 }
 0x1d9   :  { %v259_v50 = vmax.f32 %v250_v47, 0.0 }
 0x1da   :  { %v254_v52 = vpop.f32.mrb[4].mxu1 }
 0x1db   :  { %v632_v53 = vpack.c.bf16 %v259_v50, %v258_v49  ;;  %v255_v54 = vadd.f32 %v254_v52, %v167_v51  ;;  %v594_v55 = vpop.f32.mrb[5].mxu1 }
 0x1dd   :  { %633 = vmatpush3.bf16.msra.mxu0 %v632_v53  ;;  %v260_v56 = vmax.f32 %v255_v54, 0.0 }
 0x1de   :  { %599 = vmatprep.subr.mxu0 %v706_v1 }
 0x1e1   :  { %600 = vmatpush3.msra.mxu0 %v260_v56 }
 0x1e2   :  { %602 = vmatmul.mubr.msk.f32.vlgmr.msra.gmra.mrb[6].mxu0 %vm53_vm1, %v523_v57 }
 0x1e3   :  { %604 = vmatprep.mubr.msk.f32.mxu0 %vm705_vm0, %v706_v1 }
 0x1e6   :  { %605 = vmatmul.mubr.msk.f32.gmra.mrb[8].mxu0 %vm53_vm1, %v524_v58 }
 0x1e7   :  { %607 = vmatprep.mubr.msk.f32.mxu0 %vm705_vm0, %v706_v1 }
 0x1ea   :  { %608 = vmatmul.mubr.msk.f32.gmra.mrb[10].mxu0 %vm53_vm1, %v525_v59 }
 0x2b5   :  { %v359_v60 = vpop.f32.mrb[6].mxu0 }
 0x2b6   :  { %v603_v61 = vpop.f32.mrb[7].mxu0  ;;  %v360_v63 = vadd.f32 %v359_v60, %v272_v62 }
 0x2b8   :  { %v373_v5 = vmax.f32 %v360_v63, 0.0 }
 0x2b9   :  { %v364_v2 = vpop.f32.mrb[8].mxu0 }
 0x2ba   :  { %v365_v3 = vadd.f32 %v364_v2, %v277_v0  ;;  %v606_v4 = vpop.f32.mrb[9].mxu0 }
 0x2bc   :  { %v374_v6 = vmax.f32 %v365_v3, 0.0 }
 0x2bd   :  { %v369_v8 = vpop.f32.mrb[10].mxu0 }
 0x2be   :  { %v635_v9 = vpack.c.bf16 %v374_v6, %v373_v5  ;;  %v370_v10 = vadd.f32 %v369_v8, %v282_v7  ;;  %v609_v11 = vpop.f32.mrb[11].mxu0 }
 0x2c0   :  { %636 = vmatpush3.bf16.msra.mxu1 %v635_v9  ;;  %v375_v12 = vmax.f32 %v370_v10, 0.0 }
 0x2c1   :  { %614 = vmatprep.subr.mxu1 %v706_v1 }
 0x2c4   :  { %615 = vmatpush3.msra.mxu1 %v375_v12 }
 0x2c5   :  { %617 = vmatmul.mubr.msk.f32.vlgmr.msra.gmra.mrb[6].mxu1 %vm53_vm1, %v532_v13 }
 0x2c6   :  { %619 = vmatprep.mubr.msk.f32.mxu1 %vm705_vm0, %v706_v1 }
 0x2c9   :  { %620 = vmatmul.mubr.msk.f32.gmra.mrb[8].mxu1 %vm53_vm1, %v533_v14 }
 0x2ca   :  { %622 = vmatprep.mubr.msk.f32.mxu1 %vm705_vm0, %v706_v1 }
 0x2cd   :  { %623 = vmatmul.mubr.msk.f32.gmra.mrb[10].mxu1 %vm53_vm1, %v534_v15 }
 0x398   :  { %v474_v17 = vpop.f32.mrb[6].mxu1 }
 0x399   :  { %v475_v18 = vadd.f32 %v474_v17, %v387_v16  ;;  %v618_v19 = vpop.f32.mrb[7].mxu1 }
 0x39b   :  { %647 = vtanh.f32 %v475_v18 }
 0x39c   :  { %v479_v21 = vpop.f32.mrb[8].mxu1 }
 0x39d   :  { %v480_v22 = vadd.f32 %v479_v21, %v392_v20  ;;  %v621_v23 = vpop.f32.mrb[9].mxu1 }
 0x39f   :  { %649 = vtanh.f32 %v480_v22 }
 0x3a0   :  { %v484_v25 = vpop.f32.mrb[10].mxu1 }
 0x3a1   :  { %v485_v26 = vadd.f32 %v484_v25, %v397_v24  ;;  %v624_v1 = vpop.f32.mrb[11].mxu1 }
 0x3a3   :  { %651 = vtanh.f32 %v485_v26 }
 0x3a5   :  { %v648_v27 = vpop.eup %647 }
 0x3a6   :  { %491 = vst [vmem:[#allocation5] sm:$0xff] %v648_v27 }
 0x3a9   :  { %v650_v28 = vpop.eup %649 }
 0x3aa   :  { %492 = vst [vmem:[#allocation5 + $0x8] sm:$0xff] %v650_v28 }
 0x3ad   :  { %v652_v29 = vpop.eup %651 }
 0x3ae   :  { %493 = vst [vmem:[#allocation5 + $0x10] sm:$0xff] %v652_v29 }
 0x3af   :  { %686 = shalt.err (!%p683_p12)
}
 0x3b0   :  { %s687_s25 = scalar_lea.hbm %s878_s3, 384 }
 0x3b1   :  { %p688_p13 = scmp.ne.s32.totalorder %s878_s3, %s687_s25  ;;  %p691_p0 = scmp.lt.u32.totalorder %s687_s25, %s878_s3 }
 0x3b3   :  { %p693_p1 = pnand %p691_p0, %p688_p13 }
 0x3b5   :  { %696 = shalt.err (!%p693_p1)
}
 0x3b6   :  { %505 = dma.vmem_to_hbm [thread:$0]  %s500_s19, 384, %s878_s3, [#allocation4], %s702_s22, %s702_s22, %s703_s23  }
 0x3b7   :  { %699 = dma.done.wait [#allocation4], 384  }
 0x3b8   :  { %700 = vsyncadd [#allocation4], 4294966912 }
 0x3b9   :  { %509 = vsyncpa [#allocation3], 1 }
 0x3ba   :  { %510 = vsyncpa [#allocation4], 1 }

</bundles_post_ra>
